<compile_context>
chip_gen: v7x
topology: tpu7x:2x2x1
jax: 0.10.0
libtpu: 0.0.40
codegen_flags: <defaults>
</compile_context>

<pallas_src>
import functools

import jax
import jax.numpy as jnp
from jax.experimental import pallas as pl
from jax.experimental.pallas import tpu as pltpu


def _round_up(x, n):
    return ((x + n - 1) // n) * n


def _encdec_kernel(x_ref, wa_ref, ba_ref, wf_ref, bf_ref, wo_ref, bo_ref,
                   o_ref, *, h1_dim):
    f32 = jnp.float32
    bf16 = jnp.bfloat16

    # Stage A (block-diagonal merge of encoder-L1 + decoder-direct half of L3):
    #   z[:, :H1] = enc_x @ W_emb^T + b_emb        (pre-ReLU encoder hidden)
    #   z[:, H1:] = dec_x @ W_dec1[:, :Dd]^T       (decoder-direct partial sum)
    z = jnp.dot(x_ref[...], wa_ref[...], preferred_element_type=f32) + ba_ref[...]
    h1 = jnp.maximum(z[:, :h1_dim], 0.0)
    zd = z[:, h1_dim:]

    # Stage B (encoder-L2 folded into the decoder's context half):
    #   ctx @ W3c^T == h1 @ (W3c @ W2)^T + W3c @ b2   (valid: ctx has no ReLU)
    h2 = zd + jnp.dot(h1.astype(bf16), wf_ref[...],
                      preferred_element_type=f32) + bf_ref[...]
    h2 = jnp.maximum(h2, 0.0)

    # Stage C: decoder output projection (lane-dense 128-wide, bf16 store).
    out = jnp.dot(h2.astype(bf16), wo_ref[...],
                  preferred_element_type=f32) + bo_ref[...]
    o_ref[...] = out.astype(o_ref.dtype)


def encoder_decoder_forward(enc_x, dec_x,
                            w_emb, b_emb, w_ctx, b_ctx,
                            w_dec1, b_dec1, w_dec2, b_dec2,
                            tile_m=4096):
    """enc_x/dec_x: [..., d]; weights in PyTorch nn.Linear layout ([out, in]).

    Returns bfloat16 output of shape lead + (N,). Cast outside if f32 needed.
    """
    lead = enc_x.shape[:-1]
    assert dec_x.shape[:-1] == lead
    d_enc = enc_x.shape[-1]
    d_dec = dec_x.shape[-1]

    m = 1
    for s in lead:
        m *= s

    h1 = w_emb.shape[0]
    c = w_ctx.shape[0]
    h2 = w_dec1.shape[0]
    n_out = w_dec2.shape[0]
    assert w_dec1.shape[1] == d_dec + c

    f32 = jnp.float32
    bf16 = jnp.bfloat16

    # ---- Host-side weight prep (f32 math, then bf16; all [in, out] layout) ----
    w3d = w_dec1[:, :d_dec].astype(f32)          # [H2, Dd]
    w3c = w_dec1[:, d_dec:].astype(f32)          # [H2, C]

    # Block-diagonal merge: one MXU weight for both K=16 input matmuls.
    wa = jnp.zeros((d_enc + d_dec, h1 + h2), f32)
    wa = wa.at[:d_enc, :h1].set(w_emb.astype(f32).T)
    wa = wa.at[d_enc:, h1:].set(w3d.T)
    ba = jnp.concatenate([b_emb.astype(f32),
                          jnp.zeros((h2,), f32)]).reshape(1, h1 + h2)

    # Fold encoder-L2 into the context half of decoder-L1.
    wf = (w3c @ w_ctx.astype(f32)).T                                   # [H1, H2]
    bfold = (b_dec1.astype(f32) + w3c @ b_ctx.astype(f32)).reshape(1, h2)

    wo = w_dec2.astype(f32).T                                          # [H2, N]
    bo = b_dec2.astype(f32).reshape(1, n_out)

    wa = wa.astype(bf16)
    wf = wf.astype(bf16)
    wo = wo.astype(bf16)

    # Single concatenated bf16 activation stream (one DMA stream, 64 B/row).
    x_cat = jnp.concatenate(
        [enc_x.reshape(m, d_enc), dec_x.reshape(m, d_dec)],
        axis=-1).astype(bf16)

    # Row tile: big enough to amortize ~0.35 us/grid-step overhead, small
    # enough for every generation's scoped-VMEM default (v5e 16 MiB) with the
    # bf16 output; >=2 grid steps when M is large so the "parallel" axis can
    # shard across v7x's two TensorCores.
    if m <= 1024:
        tm = m
    else:
        tm = min(tile_m, _round_up(pl.cdiv(m, 2), 8))
    m_pad = _round_up(m, tm)
    if m_pad != m:
        x_cat = jnp.pad(x_cat, ((0, m_pad - m), (0, 0)))
    grid = (m_pad // tm,)

    def const_spec(a):
        return pl.BlockSpec(a.shape, lambda i: (0, 0))

    flops = 2 * m_pad * ((d_enc + d_dec) * (h1 + h2) + h1 * h2 + h2 * n_out)
    bytes_accessed = (x_cat.size * 2 + m_pad * n_out * 2
                      + (wa.size + wf.size + wo.size) * 2
                      + (ba.size + bfold.size + bo.size) * 4)

    out2d = pl.pallas_call(
        functools.partial(_encdec_kernel, h1_dim=h1),
        out_shape=jax.ShapeDtypeStruct((m_pad, n_out), bf16),
        grid=grid,
        in_specs=[
            pl.BlockSpec((tm, d_enc + d_dec), lambda i: (i, 0)),
            const_spec(wa), const_spec(ba),
            const_spec(wf), const_spec(bfold),
            const_spec(wo), const_spec(bo),
        ],
        out_specs=pl.BlockSpec((tm, n_out), lambda i: (i, 0)),
        compiler_params=pltpu.CompilerParams(
            dimension_semantics=("parallel",)),
        cost_estimate=pl.CostEstimate(
            flops=flops, transcendentals=0, bytes_accessed=bytes_accessed),
    )(x_cat, wa, ba, wf, bfold, wo, bo)

    if m_pad != m:
        out2d = out2d[:m]
    return out2d.reshape(lead + (n_out,))


if __name__ == "__main__":
    # Small shapes consistent with the module's forward.
    batch, seq = 2, 8
    d_enc, num_hiddens, num_context = 16, 32, 32
    d_dec, dec_hiddens, num_outputs = 16, 32, 128   # 128 -> lane-dense output

    key = jax.random.PRNGKey(0)
    ks = jax.random.split(key, 10)

    def init(k, shape):
        return jax.random.normal(k, shape, dtype=jnp.float32) * 0.1

    enc_x = jax.random.normal(ks[0], (batch, seq, d_enc), dtype=jnp.float32)
    dec_x = jax.random.normal(ks[1], (batch, seq, d_dec), dtype=jnp.float32)

    # PyTorch nn.Linear layout: weight [out, in], bias [out].
    w_emb = init(ks[2], (num_hiddens, d_enc))
    b_emb = init(ks[3], (num_hiddens,))
    w_ctx = init(ks[4], (num_context, num_hiddens))
    b_ctx = init(ks[5], (num_context,))
    w_dec1 = init(ks[6], (dec_hiddens, d_dec + num_context))
    b_dec1 = init(ks[7], (dec_hiddens,))
    w_dec2 = init(ks[8], (num_outputs, dec_hiddens))
    b_dec2 = init(ks[9], (num_outputs,))

    out = encoder_decoder_forward(enc_x, dec_x,
                                  w_emb, b_emb, w_ctx, b_ctx,
                                  w_dec1, b_dec1, w_dec2, b_dec2)
    out = jax.block_until_ready(out)

    # Pure-f32 reference mirroring the original module's math exactly
    # (bf16 kernel path deviates at the ~1e-2 level).
    h1_ref = jnp.maximum(enc_x @ w_emb.T + b_emb, 0.0)
    ctx_ref = h1_ref @ w_ctx.T + b_ctx
    dec_in = jnp.concatenate([dec_x, ctx_ref], axis=-1)
    h2_ref = jnp.maximum(dec_in @ w_dec1.T + b_dec1, 0.0)
    ref = h2_ref @ w_dec2.T + b_dec2

    assert out.shape == (batch, seq, num_outputs)
    assert out.dtype == jnp.bfloat16
    assert jnp.allclose(out.astype(jnp.float32), ref, atol=5e-2, rtol=5e-2)

    print("KERNEL_OK")
</pallas_src>

<mosaic_0001>
module attributes {stable_mosaic.version = 11 : i64} {
  func.func @_encdec_kernel(%arg0: i32, %arg1: memref<16x32xbf16, #tpu.memory_space<vmem>>, %arg2: memref<32x64xbf16, #tpu.memory_space<vmem>>, %arg3: memref<1x64xf32, #tpu.memory_space<vmem>>, %arg4: memref<32x32xbf16, #tpu.memory_space<vmem>>, %arg5: memref<1x32xf32, #tpu.memory_space<vmem>>, %arg6: memref<32x128xbf16, #tpu.memory_space<vmem>>, %arg7: memref<1x128xf32, #tpu.memory_space<vmem>>, %arg8: memref<16x128xbf16, #tpu.memory_space<vmem>>) attributes {dimension_semantics = [#tpu.dimension_semantics<parallel>], iteration_bounds = array<i64: 1>, scalar_prefetch = 0 : i64, scratch_operands = 0 : i64, tpu.core_type = #tpu.core_type<tc>, window_params = [{transform_indices = @transform_0, window_bounds = array<i64: 16, 32>}, {pipeline_mode = #tpu.pipeline_mode<synchronous>, transform_indices = @transform_1, window_bounds = array<i64: 32, 64>}, {pipeline_mode = #tpu.pipeline_mode<synchronous>, transform_indices = @transform_2, window_bounds = array<i64: 1, 64>}, {pipeline_mode = #tpu.pipeline_mode<synchronous>, transform_indices = @transform_3, window_bounds = array<i64: 32, 32>}, {pipeline_mode = #tpu.pipeline_mode<synchronous>, transform_indices = @transform_4, window_bounds = array<i64: 1, 32>}, {pipeline_mode = #tpu.pipeline_mode<synchronous>, transform_indices = @transform_5, window_bounds = array<i64: 32, 128>}, {pipeline_mode = #tpu.pipeline_mode<synchronous>, transform_indices = @transform_6, window_bounds = array<i64: 1, 128>}, {transform_indices = @transform_7, window_bounds = array<i64: 16, 128>}]} {
    %c0 = arith.constant 0 : index
    %c0_0 = arith.constant 0 : index
    %0 = vector.load %arg1[%c0, %c0_0] : memref<16x32xbf16, #tpu.memory_space<vmem>>, vector<16x32xbf16>
    %c0_1 = arith.constant 0 : index
    %c0_2 = arith.constant 0 : index
    %1 = vector.load %arg2[%c0_1, %c0_2] : memref<32x64xbf16, #tpu.memory_space<vmem>>, vector<32x64xbf16>
    %cst = arith.constant dense<0.000000e+00> : vector<16x64xf32>
    %2 = tpu.matmul %0, %1, %cst {dimension_numbers = #tpu.dot_dimension_numbers<[1], [0], [0], [1], [0, 0, 1, 1], [], []>} : vector<16x32xbf16>, vector<32x64xbf16>, vector<16x64xf32> -> vector<16x64xf32>
    %c0_3 = arith.constant 0 : index
    %c0_4 = arith.constant 0 : index
    %3 = vector.load %arg3[%c0_3, %c0_4] : memref<1x64xf32, #tpu.memory_space<vmem>>, vector<1x64xf32>
    %4 = vector.broadcast %3 : vector<1x64xf32> to vector<16x64xf32>
    %5 = arith.addf %2, %4 : vector<16x64xf32>
    %6 = vector.extract_strided_slice %5 {offsets = [0, 0], sizes = [16, 32], strides = [1, 1]} : vector<16x64xf32> to vector<16x32xf32>
    %cst_5 = arith.constant 0.000000e+00 : f32
    %7 = vector.broadcast %cst_5 : f32 to vector<16x32xf32>
    %8 = arith.maximumf %6, %7 : vector<16x32xf32>
    %9 = vector.extract_strided_slice %5 {offsets = [0, 32], sizes = [16, 32], strides = [1, 1]} : vector<16x64xf32> to vector<16x32xf32>
    %10 = arith.truncf %8 : vector<16x32xf32> to vector<16x32xbf16>
    %c0_6 = arith.constant 0 : index
    %c0_7 = arith.constant 0 : index
    %11 = vector.load %arg4[%c0_6, %c0_7] : memref<32x32xbf16, #tpu.memory_space<vmem>>, vector<32x32xbf16>
    %cst_8 = arith.constant dense<0.000000e+00> : vector<16x32xf32>
    %12 = tpu.matmul %10, %11, %cst_8 {dimension_numbers = #tpu.dot_dimension_numbers<[1], [0], [0], [1], [0, 0, 1, 1], [], []>} : vector<16x32xbf16>, vector<32x32xbf16>, vector<16x32xf32> -> vector<16x32xf32>
    %13 = arith.addf %9, %12 : vector<16x32xf32>
    %c0_9 = arith.constant 0 : index
    %c0_10 = arith.constant 0 : index
    %14 = vector.load %arg5[%c0_9, %c0_10] : memref<1x32xf32, #tpu.memory_space<vmem>>, vector<1x32xf32>
    %15 = vector.broadcast %14 : vector<1x32xf32> to vector<16x32xf32>
    %16 = arith.addf %13, %15 : vector<16x32xf32>
    %cst_11 = arith.constant 0.000000e+00 : f32
    %17 = vector.broadcast %cst_11 : f32 to vector<16x32xf32>
    %18 = arith.maximumf %16, %17 : vector<16x32xf32>
    %19 = arith.truncf %18 : vector<16x32xf32> to vector<16x32xbf16>
    %c0_12 = arith.constant 0 : index
    %c0_13 = arith.constant 0 : index
    %20 = vector.load %arg6[%c0_12, %c0_13] : memref<32x128xbf16, #tpu.memory_space<vmem>>, vector<32x128xbf16>
    %cst_14 = arith.constant dense<0.000000e+00> : vector<16x128xf32>
    %21 = tpu.matmul %19, %20, %cst_14 {dimension_numbers = #tpu.dot_dimension_numbers<[1], [0], [0], [1], [0, 0, 1, 1], [], []>} : vector<16x32xbf16>, vector<32x128xbf16>, vector<16x128xf32> -> vector<16x128xf32>
    %c0_15 = arith.constant 0 : index
    %c0_16 = arith.constant 0 : index
    %22 = vector.load %arg7[%c0_15, %c0_16] : memref<1x128xf32, #tpu.memory_space<vmem>>, vector<1x128xf32>
    %23 = vector.broadcast %22 : vector<1x128xf32> to vector<16x128xf32>
    %24 = arith.addf %21, %23 : vector<16x128xf32>
    %25 = arith.truncf %24 : vector<16x128xf32> to vector<16x128xbf16>
    %c0_17 = arith.constant 0 : index
    %c0_18 = arith.constant 0 : index
    %26 = vector.load %arg8[%c0_17, %c0_18] : memref<16x128xbf16, #tpu.memory_space<vmem>>, vector<16x128xbf16>
    tpu.vector_store %arg8[%c0_17, %c0_18], %25 {strides = array<i32>} : memref<16x128xbf16, #tpu.memory_space<vmem>>, vector<16x128xbf16>,
    return
  }
  func.func @transform_0(%arg0: i32) -> (i32, i32) {
    %c0_i32 = arith.constant 0 : i32
    %c0_i32_0 = arith.constant 0 : i32
    return %arg0, %c0_i32 : i32, i32
  }
  func.func @transform_1(%arg0: i32) -> (i32, i32) {
    %c0_i32 = arith.constant 0 : i32
    %c0_i32_0 = arith.constant 0 : i32
    %c0_i32_1 = arith.constant 0 : i32
    return %c0_i32, %c0_i32_0 : i32, i32
  }
  func.func @transform_2(%arg0: i32) -> (i32, i32) {
    %c0_i32 = arith.constant 0 : i32
    %c0_i32_0 = arith.constant 0 : i32
    %c0_i32_1 = arith.constant 0 : i32
    return %c0_i32, %c0_i32_0 : i32, i32
  }
  func.func @transform_3(%arg0: i32) -> (i32, i32) {
    %c0_i32 = arith.constant 0 : i32
    %c0_i32_0 = arith.constant 0 : i32
    %c0_i32_1 = arith.constant 0 : i32
    return %c0_i32, %c0_i32_0 : i32, i32
  }
  func.func @transform_4(%arg0: i32) -> (i32, i32) {
    %c0_i32 = arith.constant 0 : i32
    %c0_i32_0 = arith.constant 0 : i32
    %c0_i32_1 = arith.constant 0 : i32
    return %c0_i32, %c0_i32_0 : i32, i32
  }
  func.func @transform_5(%arg0: i32) -> (i32, i32) {
    %c0_i32 = arith.constant 0 : i32
    %c0_i32_0 = arith.constant 0 : i32
    %c0_i32_1 = arith.constant 0 : i32
    return %c0_i32, %c0_i32_0 : i32, i32
  }
  func.func @transform_6(%arg0: i32) -> (i32, i32) {
    %c0_i32 = arith.constant 0 : i32
    %c0_i32_0 = arith.constant 0 : i32
    %c0_i32_1 = arith.constant 0 : i32
    return %c0_i32, %c0_i32_0 : i32, i32
  }
  func.func @transform_7(%arg0: i32) -> (i32, i32) {
    %c0_i32 = arith.constant 0 : i32
    %c0_i32_0 = arith.constant 0 : i32
    return %arg0, %c0_i32 : i32, i32
  }
}

</mosaic_0001>

<bundles_post_ra>
// kernel: tpu_custom_call.1
= control target key start
LH: loop header
LB: loop body
LE: loop exit
PB: predicated region body
PF: predicated region fallthrough
CT: control target
= control target key end

     0   :  { %12 = vsyncpa [#allocation3], 0  ;;  %s630_s0 = inlined_call_operand.hbm [shape: bf16[16,32], index: 0, kind: input, shape index: {}]   ;;  %s631_s1 = inlined_call_operand.hbm [shape: bf16[32,64], index: 1, kind: input, shape index: {}]   ;;  %s632_s2 = inlined_call_operand.vmem [shape: f32[1,64], index: 2, kind: input, shape index: {}]   ;;  %s633_s3 = inlined_call_operand.hbm [shape: bf16[32,32], index: 3, kind: input, shape index: {}]   ;;  %s634_s4 = inlined_call_operand.vmem [shape: f32[1,32], index: 4, kind: input, shape index: {}]   ;;  %s635_s5 = inlined_call_operand.vmem [shape: bf16[32,128], index: 5, kind: input, shape index: {}]   ;;  %s636_s6 = inlined_call_operand.vmem [shape: f32[1,128], index: 6, kind: input, shape index: {}]   ;;  %s637_s7 = inlined_call_operand.hbm [shape: bf16[16,128], index: 7, kind: output, shape index: {}]  }
   0x1   :  { %13 = vsyncpa [#allocation6], 0 }
   0x2   :  { %14 = vsyncpa [#allocation4], 0  ;;  %s495_s24 = smov [#allocation5]   ;;  %s496_s26 = smov [#allocation2]  }
   0x3   :  { %s32_s25 = sshll.u32 %s495_s24, 4  ;;  %s20_s27 = sshll.u32 %s496_s26, 4  ;;  %s33_s25 = int_to_ptr.vmem [resolvable:$true] %s32_s25  ;;  %s545_s27 = int_to_ptr.vmem [resolvable:$true] %s20_s27 }
   0x4   :  { %s401_s30 = scalar_lea.hbm %s631_s1, 256 }
   0x5   :  { %p402_p0 = scmp.ne.s32.totalorder %s631_s1, %s401_s30  ;;  %p405_p1 = scmp.lt.u32.totalorder %s401_s30, %s631_s1 }
   0x7   :  { %p407_p2 = pnand %p405_p1, %p402_p0 }
   0x9   :  { %410 = shalt.err (!%p407_p2)
}
   0xa   :  { %s411_s12 = scalar_lea.vmem %s33_s25, 256  ;;  %p416_p4 = scmp.lt.s32.totalorder %s33_s25, %s33_s25 }
   0xb   :  { %p412_p3 = scmp.ne.s32.totalorder %s33_s25, %s411_s12  ;;  %p417_p5 = scmp.lt.s32.totalorder %s411_s12, %s411_s12 }
   0xd   :  { %p418_p6 = por %p417_p5, %p416_p4 }
   0xf   :  { %p419_p7 = pnand %p418_p6, %p412_p3 }
  0x11   :  { %422 = shalt.err (!%p419_p7)
}
  0x12   :  { %s497_s13 = smov 64   ;;  %s498_s14 = smov 4  }
  0x13   :  { %38 = dma.hbm_to_vmem [thread:$0]  %s631_s1, 256, %s33_s25, [#allocation6], %s497_s13, %s497_s13, %s498_s14  }
  0x14   :  { %s423_s19 = scalar_lea.hbm %s630_s0, 128 }
  0x15   :  { %p424_p8 = scmp.ne.s32.totalorder %s630_s0, %s423_s19  ;;  %p427_p9 = scmp.lt.u32.totalorder %s423_s19, %s630_s0 }
  0x17   :  { %p429_p10 = pnand %p427_p9, %p424_p8 }
  0x19   :  { %432 = shalt.err (!%p429_p10)
}
  0x1a   :  { %s433_s24 = scalar_lea.vmem %s545_s27, 128  ;;  %p438_p12 = scmp.lt.s32.totalorder %s545_s27, %s545_s27 }
  0x1b   :  { %p434_p11 = scmp.ne.s32.totalorder %s545_s27, %s433_s24  ;;  %p439_p13 = scmp.lt.s32.totalorder %s433_s24, %s433_s24 }
  0x1d   :  { %p440_p0 = por %p439_p13, %p438_p12 }
  0x1f   :  { %p441_p1 = pnand %p440_p0, %p434_p11 }
  0x21   :  { %444 = shalt.err (!%p441_p1)
}
  0x22   :  { %26 = dma.hbm_to_vmem [thread:$0]  %s630_s0, 128, %s545_s27, [#allocation3], %s497_s13, %s497_s13, %s498_s14  }
  0x23   :  { %s499_s26 = smov [#allocation7]   ;;  %s445_s8 = scalar_lea.hbm %s633_s3, 256 }
  0x24   :  { %s46_s28 = sshll.u32 %s499_s26, 4  ;;  %p446_p2 = scmp.ne.s32.totalorder %s633_s3, %s445_s8  ;;  %s47_s28 = int_to_ptr.vmem [resolvable:$true] %s46_s28 }
  0x25   :  { %p449_p3 = scmp.lt.u32.totalorder %s445_s8, %s633_s3 }
  0x27   :  { %p451_p4 = pnand %p449_p3, %p446_p2 }
  0x29   :  { %454 = shalt.err (!%p451_p4)
}
  0x2a   :  { %s455_s15 = scalar_lea.vmem %s47_s28, 256  ;;  %p460_p6 = scmp.lt.s32.totalorder %s47_s28, %s47_s28 }
  0x2b   :  { %p456_p5 = scmp.ne.s32.totalorder %s47_s28, %s455_s15  ;;  %p461_p7 = scmp.lt.s32.totalorder %s455_s15, %s455_s15 }
  0x2d   :  { %p462_p8 = por %p461_p7, %p460_p6 }
  0x2f   :  { %p463_p9 = pnand %p462_p8, %p456_p5 }
  0x31   :  { %466 = shalt.err (!%p463_p9)
}
  0x32   :  { %52 = dma.hbm_to_vmem [thread:$0]  %s633_s3, 256, %s47_s28, [#allocation6], %s497_s13, %s497_s13, %s498_s14  }
  0x33   :  { %489 = dma.done.wait [#allocation3], 128  }
  0x34   :  { %490 = vsyncadd [#allocation3], 4294967168 }
  0x35   :  { %491 = dma.done.wait [#allocation6], 512  }
  0x36   :  { %492 = vsyncadd [#allocation6], 4294966784  ;;  %v500_v0 = vmov 0.0   ;;  %vm501_vm0 = vmmov 0   ;;  %v394_v1 = vld [vmem:[#allocation5] sm:$0xff]   ;;  %v395_v2 = vld [vmem:[#allocation5 + $0x8] sm:$0xff]  }
  0x37   :  { %360 = vmatprep.subr.bf16.mxu0 %v500_v0  ;;  %364 = vmatprep.mubr.msk.bf16.mxu0 %vm501_vm0, %v500_v0  ;;  %v396_v3 = vld [vmem:[#allocation2] sm:$0xff]   ;;  %vm99_vm1 = vcmask 261120   ;;  %v397_v4 = vld [vmem:[#allocation7] sm:$0xff]   ;;  %v329_v6 = vld [vmem:[%s632_s2] ss:$0 sm:$0xff]  ;;  %s502_s19 = smov 32  }
  0x38   :  { %368 = vmatprep.subr.bf16.mxu1 %v500_v0  ;;  %372 = vmatprep.mubr.msk.bf16.mxu1 %vm501_vm0, %v500_v0  ;;  %v398_v5 = vld [vmem:[#allocation7 + $0x8] sm:$0xff]   ;;  %v337_v16 = vld [vmem:[%s634_s4] ss:$0 sm:$0xff]  ;;  %v400_v21 = vld [vmem:[%s635_s5 + $0x8] sm:$0xff]   ;;  %s503_s4 = smov 96   ;;  %s504_s24 = smov [#allocation8]  }
  0x39   :  { %361 = vmatpush3.bf16.msra.mxu0 %v394_v1  ;;  %369 = vmatpush3.bf16.msra.mxu1 %v397_v4  ;;  %v399_v18 = vld [vmem:[%s635_s5] sm:$0xff]   ;;  %s316_s1 = sshll.u32 %s504_s24, 4  ;;  %s317_s1 = int_to_ptr.vmem [resolvable:$true] %s316_s1 }
  0x3a   :  { %362 = vmatprep.subr.bf16.mxu0 %v500_v0  ;;  %370 = vmatprep.subr.bf16.mxu1 %v500_v0  ;;  %v338_v34 = vld [vmem:[%s636_s6] ss:$0 sm:$0xff]  ;;  %s467_s25 = scalar_lea.vmem %s317_s1, 128  ;;  %p472_p11 = scmp.lt.s32.totalorder %s317_s1, %s317_s1 }
  0x3b   :  { %223 = vrot.lane.b32.xlu1 %v337_v16, %s502_s19  ;;  %p468_p10 = scmp.ne.s32.totalorder %s317_s1, %s467_s25  ;;  %p473_p12 = scmp.lt.s32.totalorder %s467_s25, %s467_s25 }
  0x3d   :  { %363 = vmatpush3.bf16.msra.mxu0 %v395_v2  ;;  %371 = vmatpush3.bf16.msra.mxu1 %v398_v5  ;;  %p474_p13 = por %p473_p12, %p472_p11 }
  0x3e   :  { %376 = vmatprep.subr.bf16.mxu0 %v500_v0 }
  0x3f   :  { %p475_p0 = pnand %p474_p13, %p468_p10 }
  0x40   :  { %365 = vmatmul.mubr.msk.bf16.vlgmr.msra.gmra.mrb[0].mxu0 %vm99_vm1, %v396_v3 }
  0x41   :  { %380 = vmatprep.mubr.msk.bf16.mxu0 %vm501_vm0, %v500_v0  ;;  %377 = vmatpush3.bf16.msra.mxu0 %v399_v18 }
  0x42   :  { %378 = vmatprep.subr.bf16.mxu0 %v500_v0 }
  0x45   :  { %379 = vmatpush3.bf16.msra.mxu0 %v400_v21 }
  0xad   :  { %v224_v25 = vpop.permute.xlu1 %223 }
 0x113   :  { %v137_v7 = vpop.f32.mrb[0].mxu0 }
 0x114   :  { %v138_v8 = vadd.f32 %v329_v6, %v137_v7  ;;  %v366_v9 = vpop.f32.mrb[1].mxu0 }
 0x115   :  { %v140_v10 = vpop.f32.mrb[2].mxu0 }
 0x116   :  { %v141_v11 = vadd.f32 %v329_v6, %v140_v10  ;;  %v367_v12 = vpop.f32.mrb[3].mxu0  ;;  %v144_v13 = vmax.f32 %v138_v8, 0.0 }
 0x118   :  { %v145_v14 = vmax.f32 %v141_v11, 0.0 }
 0x11a   :  { %v146_v15 = vpack.c.bf16 %v145_v14, %v144_v13 }
 0x11c   :  { %373 = vmatmul.mubr.msk.bf16.vlgmr.msra.gmra.mrb[0].mxu1 %vm99_vm1, %v146_v15 }
 0x1ef   :  { %v200_v17 = vpop.f32.mrb[0].mxu1 }
 0x1f0   :  { %209 = vrot.lane.b32.xlu0 %v200_v17, %s502_s19  ;;  %v374_v19 = vpop.f32.mrb[1].mxu1 }
 0x1f1   :  { %v203_v20 = vpop.f32.mrb[2].mxu1 }
 0x1f2   :  { %v375_v22 = vpop.f32.mrb[3].mxu1 }
 0x1f4   :  { %211 = vrot.lane.b32.xlu0 %v203_v20, %s502_s19 }
 0x262   :  { %v210_v23 = vpop.permute.xlu0 %209 }
 0x263   :  { %v215_v24 = vadd.f32 %v210_v23, %v138_v8 }
 0x265   :  { %v226_v27 = vadd.f32 %v224_v25, %v215_v24 }
 0x266   :  { %v212_v26 = vpop.permute.xlu0 %211 }
 0x267   :  { %v216_v28 = vadd.f32 %v212_v26, %v141_v11  ;;  %v228_v30 = vmax.f32 %v226_v27, 0.0 }
 0x269   :  { %v227_v29 = vadd.f32 %v224_v25, %v216_v28 }
 0x26b   :  { %v229_v31 = vmax.f32 %v227_v29, 0.0 }
 0x26d   :  { %v230_v32 = vpack.c.bf16 %v229_v31, %v228_v30 }
 0x26f   :  { %243 = vrot.lane.b32.xlu1 %v230_v32, %s503_s4 }
 0x2e1   :  { %v244_v33 = vpop.permute.xlu1 %243 }
 0x2e2   :  { %381 = vmatmul.mubr.msk.bf16.vlgmr.msra.gmra.mrb[4].mxu0 %vm99_vm1, %v244_v33 }
 0x3b5   :  { %v294_v35 = vpop.f32.mrb[4].mxu0 }
 0x3b6   :  { %v382_v36 = vpop.f32.mrb[5].mxu0  ;;  %v295_v38 = vadd.f32 %v338_v34, %v294_v35 }
 0x3b7   :  { %v297_v37 = vpop.f32.mrb[6].mxu0 }
 0x3b8   :  { %v298_v39 = vadd.f32 %v338_v34, %v297_v37  ;;  %v383_v40 = vpop.f32.mrb[7].mxu0 }
 0x3ba   :  { %v349_v41 = vpack.c.bf16 %v298_v39, %v295_v38 }
 0x3bc   :  { %350 = vst [vmem:[#allocation8] sm:$0xff] %v349_v41  }
 0x3bd   :  { %478 = shalt.err (!%p475_p0)
}
 0x3be   :  { %s479_s28 = scalar_lea.hbm %s637_s7, 128 }
 0x3bf   :  { %p480_p1 = scmp.ne.s32.totalorder %s637_s7, %s479_s28  ;;  %p483_p2 = scmp.lt.u32.totalorder %s479_s28, %s637_s7 }
 0x3c1   :  { %p485_p3 = pnand %p483_p2, %p480_p1 }
 0x3c3   :  { %488 = shalt.err (!%p485_p3)
}
 0x3c4   :  { %322 = dma.vmem_to_hbm [thread:$0]  %s317_s1, 128, %s637_s7, [#allocation4], %s497_s13, %s497_s13, %s498_s14  }
 0x3c5   :  { %493 = dma.done.wait [#allocation4], 128  }
 0x3c6   :  { %494 = vsyncadd [#allocation4], 4294967168 }
 0x3c7   :  { %326 = vsyncpa [#allocation3], 1 }
 0x3c8   :  { %327 = vsyncpa [#allocation6], 1 }
 0x3c9   :  { %328 = vsyncpa [#allocation4], 1 }

</bundles_post_ra>
